<compile_context>
chip_gen: v5e
topology: v5e:2x2
jax: 0.10.0
libtpu: 0.0.40
codegen_flags: <defaults>
</compile_context>

<pallas_src>
import jax
import jax.numpy as jnp
from jax import lax
from jax.experimental import pallas as pl
from jax.experimental.pallas import tpu as pltpu

# Tag-index conventions (the PyTorch module references these globals).
PAD_IDX = 0
START_TAG_IDX = 1
STOP_TAG_IDX = 2

_GROUP = 8  # time steps per unrolled group (one (8, TB) mask vreg load)


def _ceil_to(x, m):
    return ((x + m - 1) // m) * m


def _crf_fwd_kernel(maxlen_ref, h_ref, mask_ref, trans_ref, z_ref, alpha_ref):
    # maxlen_ref: (n_b,) SMEM  per-batch-tile max sequence length (prefetched)
    # h_ref:      (TS, T, TB)  emissions tile; tags on sublanes, batch on lanes
    # mask_ref:   (TS, TB)     validity mask tile
    # trans_ref:  (T, T)       trans[i, j] = score of moving from tag j to tag i
    # z_ref:      (1, TB)      partition function (lane-dense output)
    # alpha_ref:  (T, TB)      forward log-scores, carried across seq tiles
    b_idx = pl.program_id(0)
    s_idx = pl.program_id(1)
    n_s = pl.num_programs(1)
    TS = h_ref.shape[0]
    T, TB = alpha_ref.shape

    trans = trans_ref[...]                                    # (T, T) f32

    @pl.when(s_idx == 0)
    def _init():
        tag = lax.broadcasted_iota(jnp.int32, (T, TB), 0)
        alpha_ref[...] = jnp.where(tag == START_TAG_IDX, 0.0,
                                   -10000.0).astype(jnp.float32)

    # Skip sequence tiles lying entirely past every sequence in this batch tile.
    @pl.when(s_idx * TS < maxlen_ref[b_idx])
    def _recurse():
        # logsumexp_j(alpha[j,b] + trans[i,j]) as an MXU matmul:
        #   rm[i] + m_a[b] + log( (exp(trans - rm) @ exp(alpha - m_a))[i, b] )
        rm = jnp.max(trans, axis=1, keepdims=True)            # (T, 1)
        et = jnp.exp(trans - rm)                              # (T, T), in (0, 1]
        n_groups = TS // _GROUP

        def group_body(g, alpha):                             # alpha: (T_j, TB)
            base = pl.multiple_of(g * _GROUP, _GROUP)
            m_grp = mask_ref[pl.ds(base, _GROUP), :].astype(jnp.float32)
            for u in range(_GROUP):                           # unrolled
                m_a = jnp.max(alpha, axis=0, keepdims=True)   # (1, TB)
                p = jnp.exp(alpha - m_a)                      # (T, TB)
                s = jnp.dot(et, p, preferred_element_type=jnp.float32)
                emis = h_ref[base + u].astype(jnp.float32)    # (T, TB)
                alpha_t = emis + rm + m_a + jnp.log(s)        # (T, TB)
                m_row = m_grp[u:u + 1, :]                     # (1, TB)
                # Select (not arithmetic blend): alpha_t can be -inf for
                # unreachable tags; 0 * (alpha_t - alpha) would be NaN.
                alpha = jnp.where(m_row > 0.5, alpha_t, alpha)
            return alpha

        alpha_ref[...] = lax.fori_loop(0, n_groups, group_body, alpha_ref[...])

    @pl.when(s_idx == n_s - 1)
    def _finalize():
        # Z = logsumexp_j(alpha[j] + trans[STOP, j])
        final = alpha_ref[...] + trans[STOP_TAG_IDX][:, None]  # (T_j, TB)
        m = jnp.max(final, axis=0, keepdims=True)              # (1, TB)
        z_ref[...] = m + jnp.log(jnp.sum(jnp.exp(final - m), axis=0,
                                         keepdims=True))


def crf_forward(h, mask, transition):
    """CRF partition function. h: (B, S, T); mask: (B, S); transition: (T, T)."""
    B, S, T = h.shape
    itemsize = jnp.dtype(h.dtype).itemsize

    # ---- tile selection -----------------------------------------------------
    LANE = 128
    B_pad = _ceil_to(B, LANE)          # always full lanes -> unmasked vld/vst
    # Wide lane tiles fill the serial recursion's pipeline bubbles, but keep
    # >= 2 batch tiles so the "parallel" axis can shard across v7x's 2 TCs.
    if B_pad >= 8 * LANE:
        TB = 4 * LANE
    elif B_pad >= 4 * LANE:
        TB = 2 * LANE
    else:
        TB = LANE
    B_pad = _ceil_to(B_pad, TB)

    T_pad = _ceil_to(T, 8)             # full sublanes for alpha / trans tiles

    if S <= 256:
        TS = _ceil_to(S, _GROUP)
        S_pad = TS
    else:
        TS = 256
        while TS > 32 and 2 * TS * T_pad * TB * itemsize > (8 << 20):
            TS //= 2                   # keep double-buffered h tile modest
        S_pad = _ceil_to(S, TS)

    # ---- layout: batch on lanes, sequence leading ---------------------------
    h_t = jnp.transpose(h, (1, 2, 0))                         # (S, T, B)
    mask_f = mask.astype(jnp.float32)
    mask_t = jnp.transpose(mask_f, (1, 0))                    # (S, B)
    trans_f = transition.astype(jnp.float32)

    pad_s, pad_t, pad_b = S_pad - S, T_pad - T, B_pad - B
    if pad_s or pad_t or pad_b:
        h_t = jnp.pad(h_t, ((0, pad_s), (0, pad_t), (0, pad_b)))
        mask_t = jnp.pad(mask_t, ((0, pad_s), (0, pad_b)))
    if pad_t:
        trans_f = jnp.pad(trans_f, ((0, pad_t), (0, pad_t)),
                          constant_values=-10000.0)

    # Per-batch-tile max valid length (scalar prefetch -> skip padded seq tiles).
    n_b = B_pad // TB
    pos = (jnp.arange(S, dtype=jnp.int32)[None, :] + 1) * (mask_f > 0.5)
    lengths = jnp.max(pos.astype(jnp.int32), axis=1)          # (B,)
    lengths = jnp.pad(lengths, (0, B_pad - B))
    maxlen = jnp.max(lengths.reshape(n_b, TB), axis=1).astype(jnp.int32)

    grid = (n_b, S_pad // TS)

    est = (2 * TS * T_pad * TB * itemsize     # double-buffered h tiles
           + 2 * TS * TB * 4                  # double-buffered mask tiles
           + 2 * T_pad * T_pad * 4            # transition
           + T_pad * TB * 4                   # alpha scratch
           + 10 * T_pad * TB * 4              # p / matmul / emission temps
           + 4 * TB * 4)                      # output
    try:
        cap = int(pltpu.get_tpu_info().vmem_capacity_bytes * 3 // 4)
    except Exception:
        cap = 48 * 1024 * 1024                # safe on v7x (64 MiB physical)
    vmem_limit = int(min(max(2 * est, 32 * 1024 * 1024), cap))

    z = pl.pallas_call(
        _crf_fwd_kernel,
        out_shape=jax.ShapeDtypeStruct((1, B_pad), jnp.float32),
        grid_spec=pltpu.PrefetchScalarGridSpec(
            num_scalar_prefetch=1,
            grid=grid,
            in_specs=[
                pl.BlockSpec((TS, T_pad, TB), lambda b, s, ml: (s, 0, b)),
                pl.BlockSpec((TS, TB), lambda b, s, ml: (s, b)),
                pl.BlockSpec((T_pad, T_pad), lambda b, s, ml: (0, 0)),
            ],
            out_specs=pl.BlockSpec((1, TB), lambda b, s, ml: (0, b)),
            scratch_shapes=[pltpu.VMEM((T_pad, TB), jnp.float32)],
        ),
        compiler_params=pltpu.CompilerParams(
            dimension_semantics=("parallel", "arbitrary"),
            vmem_limit_bytes=vmem_limit,
        ),
    )(maxlen, h_t, mask_t, trans_f)
    return z[0, :B]                                           # (B,)


def make_transition(num_tags, key):
    t = jax.random.normal(key, (num_tags, num_tags), dtype=jnp.float32)
    t = t.at[START_TAG_IDX, :].set(-10000.0)
    t = t.at[:, STOP_TAG_IDX].set(-10000.0)
    t = t.at[:, PAD_IDX].set(-10000.0)
    t = t.at[PAD_IDX, :].set(-10000.0)
    t = t.at[PAD_IDX, STOP_TAG_IDX].set(0.0)
    t = t.at[PAD_IDX, PAD_IDX].set(0.0)
    return t


def crf_forward_ref(h, mask, trans):
    # Pure-JAX reference mirroring the PyTorch code exactly.
    B, S, T = h.shape
    alpha = jnp.full((B, T), -10000.0, jnp.float32).at[:, START_TAG_IDX].set(0.0)
    for t in range(S):
        scores = alpha[:, None, :] + h[:, t][:, :, None] + trans[None, :, :]
        m = scores.max(-1)
        alpha_t = m + jnp.log(jnp.exp(scores - m[..., None]).sum(-1))
        m_t = mask[:, t][:, None]
        alpha = alpha_t * m_t + alpha * (1.0 - m_t)
    final = alpha + trans[STOP_TAG_IDX]
    m = final.max(-1)
    return m + jnp.log(jnp.exp(final - m[:, None]).sum(-1))


if __name__ == "__main__":
    key = jax.random.PRNGKey(0)
    k_h, k_t, k_len = jax.random.split(key, 3)

    batch, seq, num_tags = 4, 8, 8
    h = jax.random.normal(k_h, (batch, seq, num_tags), dtype=jnp.float32)
    transition = make_transition(num_tags, k_t)

    # Non-increasing validity mask (each sequence has a length in [1, seq]).
    lengths = jax.random.randint(k_len, (batch,), 1, seq + 1)
    mask = (jnp.arange(seq)[None, :] < lengths[:, None]).astype(jnp.float32)

    z = crf_forward(h, mask, transition)
    jax.block_until_ready(z)

    z_ref = crf_forward_ref(h, mask, transition)
    assert jnp.allclose(z, z_ref, rtol=1e-4, atol=1e-4), (z, z_ref)

    # TODO(synk): CRF.decode()'s host-side backpointer traversal (Python list
    # backtracking) and CRF.score()'s per-example gather loop are intentionally
    # not implemented as kernels (forward/partition-function only).
    print("KERNEL_OK")
</pallas_src>

<mosaic_0001>
module attributes {stable_mosaic.version = 11 : i64} {
  func.func @_crf_fwd_kernel(%arg0: i32, %arg1: i32, %arg2: memref<1xi32, #tpu.memory_space<smem>>, %arg3: memref<8x8x128xf32, #tpu.memory_space<vmem>>, %arg4: memref<8x128xf32, #tpu.memory_space<vmem>>, %arg5: memref<8x8xf32, #tpu.memory_space<vmem>>, %arg6: memref<1x128xf32, #tpu.memory_space<vmem>>, %arg7: memref<8x128xf32, #tpu.memory_space<vmem>>) attributes {dimension_semantics = [#tpu.dimension_semantics<parallel>, #tpu.dimension_semantics<arbitrary>], iteration_bounds = array<i64: 1, 1>, scalar_prefetch = 1 : i64, scratch_operands = 1 : i64, tpu.core_type = #tpu.core_type<tc>, window_params = [{transform_indices = @transform_0, window_bounds = array<i64: 8, 8, 128>}, {transform_indices = @transform_1, window_bounds = array<i64: 8, 128>}, {pipeline_mode = #tpu.pipeline_mode<synchronous>, transform_indices = @transform_2, window_bounds = array<i64: 8, 8>}, {transform_indices = @transform_3, window_bounds = array<i64: 1, 128>}]} {
    %c0 = arith.constant 0 : index
    %c0_0 = arith.constant 0 : index
    %0 = vector.load %arg5[%c0, %c0_0] : memref<8x8xf32, #tpu.memory_space<vmem>>, vector<8x8xf32>
    %c0_i32 = arith.constant 0 : i32
    %1 = arith.cmpi eq, %arg1, %c0_i32 : i32
    %2 = arith.extui %1 : i1 to i32
    %c0_i32_1 = arith.constant 0 : i32
    %3 = arith.cmpi ne, %2, %c0_i32_1 : i32
    scf.if %3 {
      %13 = tpu.iota {dimensions = array<i32: 0>} : vector<8x128xi32>
      %c1_i32 = arith.constant 1 : i32
      %14 = vector.broadcast %c1_i32 : i32 to vector<8x128xi32>
      %15 = arith.cmpi eq, %13, %14 : vector<8x128xi32>
      %cst = arith.constant 0.000000e+00 : f32
      %cst_5 = arith.constant -1.000000e+04 : f32
      %16 = vector.broadcast %cst : f32 to vector<8x128xf32>
      %17 = vector.broadcast %cst_5 : f32 to vector<8x128xf32>
      %18 = arith.select %15, %16, %17 : vector<8x128xi1>, vector<8x128xf32>
      %c0_6 = arith.constant 0 : index
      %c0_7 = arith.constant 0 : index
      %19 = vector.load %arg7[%c0_6, %c0_7] : memref<8x128xf32, #tpu.memory_space<vmem>>, vector<8x128xf32>
      tpu.vector_store %arg7[%c0_6, %c0_7], %18 {strides = array<i32>} : memref<8x128xf32, #tpu.memory_space<vmem>>, vector<8x128xf32>,
    } else {
    }
    %c8_i32 = arith.constant 8 : i32
    %4 = arith.muli %arg1, %c8_i32 : i32
    %5 = arith.index_cast %arg0 : i32 to index
    %6 = memref.load %arg2[%5] : memref<1xi32, #tpu.memory_space<smem>>
    %7 = arith.cmpi slt, %4, %6 : i32
    %8 = arith.extui %7 : i1 to i32
    %c0_i32_2 = arith.constant 0 : i32
    %9 = arith.cmpi ne, %8, %c0_i32_2 : i32
    scf.if %9 {
      %cst = arith.constant dense<0xFF800000> : vector<8xf32>
      %13 = vector.multi_reduction <maximumf>, %0, %cst [1] : vector<8x8xf32> to vector<8xf32>
      %14 = vector.shape_cast %13 : vector<8xf32> to vector<8x1xf32>
      %15 = vector.broadcast %14 : vector<8x1xf32> to vector<8x8xf32>
      %16 = arith.subf %0, %15 : vector<8x8xf32>
      %17 = math.exp %16 : vector<8x8xf32>
      %c0_5 = arith.constant 0 : index
      %c0_6 = arith.constant 0 : index
      %18 = vector.load %arg7[%c0_5, %c0_6] : memref<8x128xf32, #tpu.memory_space<vmem>>, vector<8x128xf32>
      %c0_i32_7 = arith.constant 0 : i32
      %c8_i32_8 = arith.constant 8 : i32
      %19 = arith.muli %c0_i32_7, %c8_i32_8 : i32
      %20 = tpu.assume_multiple %19, 8 : i32
      %21 = arith.index_cast %20 : i32 to index
      %c0_9 = arith.constant 0 : index
      %22 = vector.load %arg4[%21, %c0_9] : memref<8x128xf32, #tpu.memory_space<vmem>>, vector<8x128xf32>
      %cst_10 = arith.constant dense<0xFF800000> : vector<128xf32>
      %23 = vector.multi_reduction <maximumf>, %18, %cst_10 [0] : vector<8x128xf32> to vector<128xf32>
      %24 = vector.shape_cast %23 : vector<128xf32> to vector<1x128xf32>
      %25 = vector.broadcast %24 : vector<1x128xf32> to vector<8x128xf32>
      %26 = arith.subf %18, %25 : vector<8x128xf32>
      %27 = math.exp %26 : vector<8x128xf32>
      %cst_11 = arith.constant dense<0.000000e+00> : vector<8x128xf32>
      %28 = tpu.matmul %17, %27, %cst_11 {dimension_numbers = #tpu.dot_dimension_numbers<[1], [0], [0], [1], [0, 0, 1, 1], [], []>} : vector<8x8xf32>, vector<8x128xf32>, vector<8x128xf32> -> vector<8x128xf32>
      %c0_i32_12 = arith.constant 0 : i32
      %29 = arith.addi %20, %c0_i32_12 : i32
      %30 = arith.index_cast %29 : i32 to index
      %c0_13 = arith.constant 0 : index
      %c0_14 = arith.constant 0 : index
      %31 = vector.load %arg3[%30, %c0_13, %c0_14] : memref<8x8x128xf32, #tpu.memory_space<vmem>>, vector<1x8x128xf32>
      %32 = vector.shape_cast %31 : vector<1x8x128xf32> to vector<8x128xf32>
      %33 = vector.broadcast %14 : vector<8x1xf32> to vector<8x128xf32>
      %34 = arith.addf %32, %33 : vector<8x128xf32>
      %35 = vector.broadcast %24 : vector<1x128xf32> to vector<8x128xf32>
      %36 = arith.addf %34, %35 : vector<8x128xf32>
      %37 = math.log %28 : vector<8x128xf32>
      %38 = arith.addf %36, %37 : vector<8x128xf32>
      %39 = vector.extract_strided_slice %22 {offsets = [0, 0], sizes = [1, 128], strides = [1, 1]} : vector<8x128xf32> to vector<1x128xf32>
      %cst_15 = arith.constant 5.000000e-01 : f32
      %40 = vector.broadcast %cst_15 : f32 to vector<1x128xf32>
      %41 = arith.cmpf ogt, %39, %40 : vector<1x128xf32>
      %42 = vector.shape_cast %41 : vector<1x128xi1> to vector<1x128xi1>
      %43 = vector.broadcast %42 : vector<1x128xi1> to vector<8x128xi1>
      %44 = arith.select %43, %38, %18 : vector<8x128xi1>, vector<8x128xf32>
      %cst_16 = arith.constant dense<0xFF800000> : vector<128xf32>
      %45 = vector.multi_reduction <maximumf>, %44, %cst_16 [0] : vector<8x128xf32> to vector<128xf32>
      %46 = vector.shape_cast %45 : vector<128xf32> to vector<1x128xf32>
      %47 = vector.broadcast %46 : vector<1x128xf32> to vector<8x128xf32>
      %48 = arith.subf %44, %47 : vector<8x128xf32>
      %49 = math.exp %48 : vector<8x128xf32>
      %cst_17 = arith.constant dense<0.000000e+00> : vector<8x128xf32>
      %50 = tpu.matmul %17, %49, %cst_17 {dimension_numbers = #tpu.dot_dimension_numbers<[1], [0], [0], [1], [0, 0, 1, 1], [], []>} : vector<8x8xf32>, vector<8x128xf32>, vector<8x128xf32> -> vector<8x128xf32>
      %c1_i32 = arith.constant 1 : i32
      %51 = arith.addi %20, %c1_i32 : i32
      %52 = arith.index_cast %51 : i32 to index
      %c0_18 = arith.constant 0 : index
      %c0_19 = arith.constant 0 : index
      %53 = vector.load %arg3[%52, %c0_18, %c0_19] : memref<8x8x128xf32, #tpu.memory_space<vmem>>, vector<1x8x128xf32>
      %54 = vector.shape_cast %53 : vector<1x8x128xf32> to vector<8x128xf32>
      %55 = vector.broadcast %14 : vector<8x1xf32> to vector<8x128xf32>
      %56 = arith.addf %54, %55 : vector<8x128xf32>
      %57 = vector.broadcast %46 : vector<1x128xf32> to vector<8x128xf32>
      %58 = arith.addf %56, %57 : vector<8x128xf32>
      %59 = math.log %50 : vector<8x128xf32>
      %60 = arith.addf %58, %59 : vector<8x128xf32>
      %61 = vector.extract_strided_slice %22 {offsets = [1, 0], sizes = [1, 128], strides = [1, 1]} : vector<8x128xf32> to vector<1x128xf32>
      %cst_20 = arith.constant 5.000000e-01 : f32
      %62 = vector.broadcast %cst_20 : f32 to vector<1x128xf32>
      %63 = arith.cmpf ogt, %61, %62 : vector<1x128xf32>
      %64 = vector.shape_cast %63 : vector<1x128xi1> to vector<1x128xi1>
      %65 = vector.broadcast %64 : vector<1x128xi1> to vector<8x128xi1>
      %66 = arith.select %65, %60, %44 : vector<8x128xi1>, vector<8x128xf32>
      %cst_21 = arith.constant dense<0xFF800000> : vector<128xf32>
      %67 = vector.multi_reduction <maximumf>, %66, %cst_21 [0] : vector<8x128xf32> to vector<128xf32>
      %68 = vector.shape_cast %67 : vector<128xf32> to vector<1x128xf32>
      %69 = vector.broadcast %68 : vector<1x128xf32> to vector<8x128xf32>
      %70 = arith.subf %66, %69 : vector<8x128xf32>
      %71 = math.exp %70 : vector<8x128xf32>
      %cst_22 = arith.constant dense<0.000000e+00> : vector<8x128xf32>
      %72 = tpu.matmul %17, %71, %cst_22 {dimension_numbers = #tpu.dot_dimension_numbers<[1], [0], [0], [1], [0, 0, 1, 1], [], []>} : vector<8x8xf32>, vector<8x128xf32>, vector<8x128xf32> -> vector<8x128xf32>
      %c2_i32 = arith.constant 2 : i32
      %73 = arith.addi %20, %c2_i32 : i32
      %74 = arith.index_cast %73 : i32 to index
      %c0_23 = arith.constant 0 : index
      %c0_24 = arith.constant 0 : index
      %75 = vector.load %arg3[%74, %c0_23, %c0_24] : memref<8x8x128xf32, #tpu.memory_space<vmem>>, vector<1x8x128xf32>
      %76 = vector.shape_cast %75 : vector<1x8x128xf32> to vector<8x128xf32>
      %77 = vector.broadcast %14 : vector<8x1xf32> to vector<8x128xf32>
      %78 = arith.addf %76, %77 : vector<8x128xf32>
      %79 = vector.broadcast %68 : vector<1x128xf32> to vector<8x128xf32>
      %80 = arith.addf %78, %79 : vector<8x128xf32>
      %81 = math.log %72 : vector<8x128xf32>
      %82 = arith.addf %80, %81 : vector<8x128xf32>
      %83 = vector.extract_strided_slice %22 {offsets = [2, 0], sizes = [1, 128], strides = [1, 1]} : vector<8x128xf32> to vector<1x128xf32>
      %cst_25 = arith.constant 5.000000e-01 : f32
      %84 = vector.broadcast %cst_25 : f32 to vector<1x128xf32>
      %85 = arith.cmpf ogt, %83, %84 : vector<1x128xf32>
      %86 = vector.shape_cast %85 : vector<1x128xi1> to vector<1x128xi1>
      %87 = vector.broadcast %86 : vector<1x128xi1> to vector<8x128xi1>
      %88 = arith.select %87, %82, %66 : vector<8x128xi1>, vector<8x128xf32>
      %cst_26 = arith.constant dense<0xFF800000> : vector<128xf32>
      %89 = vector.multi_reduction <maximumf>, %88, %cst_26 [0] : vector<8x128xf32> to vector<128xf32>
      %90 = vector.shape_cast %89 : vector<128xf32> to vector<1x128xf32>
      %91 = vector.broadcast %90 : vector<1x128xf32> to vector<8x128xf32>
      %92 = arith.subf %88, %91 : vector<8x128xf32>
      %93 = math.exp %92 : vector<8x128xf32>
      %cst_27 = arith.constant dense<0.000000e+00> : vector<8x128xf32>
      %94 = tpu.matmul %17, %93, %cst_27 {dimension_numbers = #tpu.dot_dimension_numbers<[1], [0], [0], [1], [0, 0, 1, 1], [], []>} : vector<8x8xf32>, vector<8x128xf32>, vector<8x128xf32> -> vector<8x128xf32>
      %c3_i32 = arith.constant 3 : i32
      %95 = arith.addi %20, %c3_i32 : i32
      %96 = arith.index_cast %95 : i32 to index
      %c0_28 = arith.constant 0 : index
      %c0_29 = arith.constant 0 : index
      %97 = vector.load %arg3[%96, %c0_28, %c0_29] : memref<8x8x128xf32, #tpu.memory_space<vmem>>, vector<1x8x128xf32>
      %98 = vector.shape_cast %97 : vector<1x8x128xf32> to vector<8x128xf32>
      %99 = vector.broadcast %14 : vector<8x1xf32> to vector<8x128xf32>
      %100 = arith.addf %98, %99 : vector<8x128xf32>
      %101 = vector.broadcast %90 : vector<1x128xf32> to vector<8x128xf32>
      %102 = arith.addf %100, %101 : vector<8x128xf32>
      %103 = math.log %94 : vector<8x128xf32>
      %104 = arith.addf %102, %103 : vector<8x128xf32>
      %105 = vector.extract_strided_slice %22 {offsets = [3, 0], sizes = [1, 128], strides = [1, 1]} : vector<8x128xf32> to vector<1x128xf32>
      %cst_30 = arith.constant 5.000000e-01 : f32
      %106 = vector.broadcast %cst_30 : f32 to vector<1x128xf32>
      %107 = arith.cmpf ogt, %105, %106 : vector<1x128xf32>
      %108 = vector.shape_cast %107 : vector<1x128xi1> to vector<1x128xi1>
      %109 = vector.broadcast %108 : vector<1x128xi1> to vector<8x128xi1>
      %110 = arith.select %109, %104, %88 : vector<8x128xi1>, vector<8x128xf32>
      %cst_31 = arith.constant dense<0xFF800000> : vector<128xf32>
      %111 = vector.multi_reduction <maximumf>, %110, %cst_31 [0] : vector<8x128xf32> to vector<128xf32>
      %112 = vector.shape_cast %111 : vector<128xf32> to vector<1x128xf32>
      %113 = vector.broadcast %112 : vector<1x128xf32> to vector<8x128xf32>
      %114 = arith.subf %110, %113 : vector<8x128xf32>
      %115 = math.exp %114 : vector<8x128xf32>
      %cst_32 = arith.constant dense<0.000000e+00> : vector<8x128xf32>
      %116 = tpu.matmul %17, %115, %cst_32 {dimension_numbers = #tpu.dot_dimension_numbers<[1], [0], [0], [1], [0, 0, 1, 1], [], []>} : vector<8x8xf32>, vector<8x128xf32>, vector<8x128xf32> -> vector<8x128xf32>
      %c4_i32 = arith.constant 4 : i32
      %117 = arith.addi %20, %c4_i32 : i32
      %118 = arith.index_cast %117 : i32 to index
      %c0_33 = arith.constant 0 : index
      %c0_34 = arith.constant 0 : index
      %119 = vector.load %arg3[%118, %c0_33, %c0_34] : memref<8x8x128xf32, #tpu.memory_space<vmem>>, vector<1x8x128xf32>
      %120 = vector.shape_cast %119 : vector<1x8x128xf32> to vector<8x128xf32>
      %121 = vector.broadcast %14 : vector<8x1xf32> to vector<8x128xf32>
      %122 = arith.addf %120, %121 : vector<8x128xf32>
      %123 = vector.broadcast %112 : vector<1x128xf32> to vector<8x128xf32>
      %124 = arith.addf %122, %123 : vector<8x128xf32>
      %125 = math.log %116 : vector<8x128xf32>
      %126 = arith.addf %124, %125 : vector<8x128xf32>
      %127 = vector.extract_strided_slice %22 {offsets = [4, 0], sizes = [1, 128], strides = [1, 1]} : vector<8x128xf32> to vector<1x128xf32>
      %cst_35 = arith.constant 5.000000e-01 : f32
      %128 = vector.broadcast %cst_35 : f32 to vector<1x128xf32>
      %129 = arith.cmpf ogt, %127, %128 : vector<1x128xf32>
      %130 = vector.shape_cast %129 : vector<1x128xi1> to vector<1x128xi1>
      %131 = vector.broadcast %130 : vector<1x128xi1> to vector<8x128xi1>
      %132 = arith.select %131, %126, %110 : vector<8x128xi1>, vector<8x128xf32>
      %cst_36 = arith.constant dense<0xFF800000> : vector<128xf32>
      %133 = vector.multi_reduction <maximumf>, %132, %cst_36 [0] : vector<8x128xf32> to vector<128xf32>
      %134 = vector.shape_cast %133 : vector<128xf32> to vector<1x128xf32>
      %135 = vector.broadcast %134 : vector<1x128xf32> to vector<8x128xf32>
      %136 = arith.subf %132, %135 : vector<8x128xf32>
      %137 = math.exp %136 : vector<8x128xf32>
      %cst_37 = arith.constant dense<0.000000e+00> : vector<8x128xf32>
      %138 = tpu.matmul %17, %137, %cst_37 {dimension_numbers = #tpu.dot_dimension_numbers<[1], [0], [0], [1], [0, 0, 1, 1], [], []>} : vector<8x8xf32>, vector<8x128xf32>, vector<8x128xf32> -> vector<8x128xf32>
      %c5_i32 = arith.constant 5 : i32
      %139 = arith.addi %20, %c5_i32 : i32
      %140 = arith.index_cast %139 : i32 to index
      %c0_38 = arith.constant 0 : index
      %c0_39 = arith.constant 0 : index
      %141 = vector.load %arg3[%140, %c0_38, %c0_39] : memref<8x8x128xf32, #tpu.memory_space<vmem>>, vector<1x8x128xf32>
      %142 = vector.shape_cast %141 : vector<1x8x128xf32> to vector<8x128xf32>
      %143 = vector.broadcast %14 : vector<8x1xf32> to vector<8x128xf32>
      %144 = arith.addf %142, %143 : vector<8x128xf32>
      %145 = vector.broadcast %134 : vector<1x128xf32> to vector<8x128xf32>
      %146 = arith.addf %144, %145 : vector<8x128xf32>
      %147 = math.log %138 : vector<8x128xf32>
      %148 = arith.addf %146, %147 : vector<8x128xf32>
      %149 = vector.extract_strided_slice %22 {offsets = [5, 0], sizes = [1, 128], strides = [1, 1]} : vector<8x128xf32> to vector<1x128xf32>
      %cst_40 = arith.constant 5.000000e-01 : f32
      %150 = vector.broadcast %cst_40 : f32 to vector<1x128xf32>
      %151 = arith.cmpf ogt, %149, %150 : vector<1x128xf32>
      %152 = vector.shape_cast %151 : vector<1x128xi1> to vector<1x128xi1>
      %153 = vector.broadcast %152 : vector<1x128xi1> to vector<8x128xi1>
      %154 = arith.select %153, %148, %132 : vector<8x128xi1>, vector<8x128xf32>
      %cst_41 = arith.constant dense<0xFF800000> : vector<128xf32>
      %155 = vector.multi_reduction <maximumf>, %154, %cst_41 [0] : vector<8x128xf32> to vector<128xf32>
      %156 = vector.shape_cast %155 : vector<128xf32> to vector<1x128xf32>
      %157 = vector.broadcast %156 : vector<1x128xf32> to vector<8x128xf32>
      %158 = arith.subf %154, %157 : vector<8x128xf32>
      %159 = math.exp %158 : vector<8x128xf32>
      %cst_42 = arith.constant dense<0.000000e+00> : vector<8x128xf32>
      %160 = tpu.matmul %17, %159, %cst_42 {dimension_numbers = #tpu.dot_dimension_numbers<[1], [0], [0], [1], [0, 0, 1, 1], [], []>} : vector<8x8xf32>, vector<8x128xf32>, vector<8x128xf32> -> vector<8x128xf32>
      %c6_i32 = arith.constant 6 : i32
      %161 = arith.addi %20, %c6_i32 : i32
      %162 = arith.index_cast %161 : i32 to index
      %c0_43 = arith.constant 0 : index
      %c0_44 = arith.constant 0 : index
      %163 = vector.load %arg3[%162, %c0_43, %c0_44] : memref<8x8x128xf32, #tpu.memory_space<vmem>>, vector<1x8x128xf32>
      %164 = vector.shape_cast %163 : vector<1x8x128xf32> to vector<8x128xf32>
      %165 = vector.broadcast %14 : vector<8x1xf32> to vector<8x128xf32>
      %166 = arith.addf %164, %165 : vector<8x128xf32>
      %167 = vector.broadcast %156 : vector<1x128xf32> to vector<8x128xf32>
      %168 = arith.addf %166, %167 : vector<8x128xf32>
      %169 = math.log %160 : vector<8x128xf32>
      %170 = arith.addf %168, %169 : vector<8x128xf32>
      %171 = vector.extract_strided_slice %22 {offsets = [6, 0], sizes = [1, 128], strides = [1, 1]} : vector<8x128xf32> to vector<1x128xf32>
      %cst_45 = arith.constant 5.000000e-01 : f32
      %172 = vector.broadcast %cst_45 : f32 to vector<1x128xf32>
      %173 = arith.cmpf ogt, %171, %172 : vector<1x128xf32>
      %174 = vector.shape_cast %173 : vector<1x128xi1> to vector<1x128xi1>
      %175 = vector.broadcast %174 : vector<1x128xi1> to vector<8x128xi1>
      %176 = arith.select %175, %170, %154 : vector<8x128xi1>, vector<8x128xf32>
      %cst_46 = arith.constant dense<0xFF800000> : vector<128xf32>
      %177 = vector.multi_reduction <maximumf>, %176, %cst_46 [0] : vector<8x128xf32> to vector<128xf32>
      %178 = vector.shape_cast %177 : vector<128xf32> to vector<1x128xf32>
      %179 = vector.broadcast %178 : vector<1x128xf32> to vector<8x128xf32>
      %180 = arith.subf %176, %179 : vector<8x128xf32>
      %181 = math.exp %180 : vector<8x128xf32>
      %cst_47 = arith.constant dense<0.000000e+00> : vector<8x128xf32>
      %182 = tpu.matmul %17, %181, %cst_47 {dimension_numbers = #tpu.dot_dimension_numbers<[1], [0], [0], [1], [0, 0, 1, 1], [], []>} : vector<8x8xf32>, vector<8x128xf32>, vector<8x128xf32> -> vector<8x128xf32>
      %c7_i32 = arith.constant 7 : i32
      %183 = arith.addi %20, %c7_i32 : i32
      %184 = arith.index_cast %183 : i32 to index
      %c0_48 = arith.constant 0 : index
      %c0_49 = arith.constant 0 : index
      %185 = vector.load %arg3[%184, %c0_48, %c0_49] : memref<8x8x128xf32, #tpu.memory_space<vmem>>, vector<1x8x128xf32>
      %186 = vector.shape_cast %185 : vector<1x8x128xf32> to vector<8x128xf32>
      %187 = vector.broadcast %14 : vector<8x1xf32> to vector<8x128xf32>
      %188 = arith.addf %186, %187 : vector<8x128xf32>
      %189 = vector.broadcast %178 : vector<1x128xf32> to vector<8x128xf32>
      %190 = arith.addf %188, %189 : vector<8x128xf32>
      %191 = math.log %182 : vector<8x128xf32>
      %192 = arith.addf %190, %191 : vector<8x128xf32>
      %193 = vector.extract_strided_slice %22 {offsets = [7, 0], sizes = [1, 128], strides = [1, 1]} : vector<8x128xf32> to vector<1x128xf32>
      %cst_50 = arith.constant 5.000000e-01 : f32
      %194 = vector.broadcast %cst_50 : f32 to vector<1x128xf32>
      %195 = arith.cmpf ogt, %193, %194 : vector<1x128xf32>
      %196 = vector.shape_cast %195 : vector<1x128xi1> to vector<1x128xi1>
      %197 = vector.broadcast %196 : vector<1x128xi1> to vector<8x128xi1>
      %198 = arith.select %197, %192, %176 : vector<8x128xi1>, vector<8x128xf32>
      %c1_i32_51 = arith.constant 1 : i32
      %c0_52 = arith.constant 0 : index
      %c0_53 = arith.constant 0 : index
      %199 = vector.load %arg7[%c0_52, %c0_53] : memref<8x128xf32, #tpu.memory_space<vmem>>, vector<8x128xf32>
      tpu.vector_store %arg7[%c0_52, %c0_53], %198 {strides = array<i32>} : memref<8x128xf32, #tpu.memory_space<vmem>>, vector<8x128xf32>,
    } else {
    }
    %c0_i32_3 = arith.constant 0 : i32
    %10 = arith.cmpi eq, %arg1, %c0_i32_3 : i32
    %11 = arith.extui %10 : i1 to i32
    %c0_i32_4 = arith.constant 0 : i32
    %12 = arith.cmpi ne, %11, %c0_i32_4 : i32
    scf.if %12 {
      %c0_5 = arith.constant 0 : index
      %c0_6 = arith.constant 0 : index
      %13 = vector.load %arg7[%c0_5, %c0_6] : memref<8x128xf32, #tpu.memory_space<vmem>>, vector<8x128xf32>
      %14 = vector.extract_strided_slice %0 {offsets = [2, 0], sizes = [1, 8], strides = [1, 1]} : vector<8x8xf32> to vector<1x8xf32>
      %15 = vector.shape_cast %14 : vector<1x8xf32> to vector<8xf32>
      %16 = vector.shape_cast %15 : vector<8xf32> to vector<8x1xf32>
      %17 = vector.broadcast %16 : vector<8x1xf32> to vector<8x128xf32>
      %18 = arith.addf %13, %17 : vector<8x128xf32>
      %cst = arith.constant dense<0xFF800000> : vector<128xf32>
      %19 = vector.multi_reduction <maximumf>, %18, %cst [0] : vector<8x128xf32> to vector<128xf32>
      %20 = vector.shape_cast %19 : vector<128xf32> to vector<1x128xf32>
      %21 = vector.broadcast %20 : vector<1x128xf32> to vector<8x128xf32>
      %22 = arith.subf %18, %21 : vector<8x128xf32>
      %23 = math.exp %22 : vector<8x128xf32>
      %cst_7 = arith.constant dense<0.000000e+00> : vector<128xf32>
      %24 = vector.multi_reduction <add>, %23, %cst_7 [0] : vector<8x128xf32> to vector<128xf32>
      %25 = vector.shape_cast %24 : vector<128xf32> to vector<1x128xf32>
      %26 = math.log %25 : vector<1x128xf32>
      %27 = arith.addf %20, %26 : vector<1x128xf32>
      %c0_8 = arith.constant 0 : index
      %c0_9 = arith.constant 0 : index
      %28 = vector.load %arg6[%c0_8, %c0_9] : memref<1x128xf32, #tpu.memory_space<vmem>>, vector<1x128xf32>
      tpu.vector_store %arg6[%c0_8, %c0_9], %27 {strides = array<i32>} : memref<1x128xf32, #tpu.memory_space<vmem>>, vector<1x128xf32>,
    } else {
    }
    return
  }
  func.func @transform_0(%arg0: i32, %arg1: i32, %arg2: memref<1xi32, #tpu.memory_space<smem>>) -> (i32, i32, i32) {
    %c0_i32 = arith.constant 0 : i32
    %c0_i32_0 = arith.constant 0 : i32
    return %arg1, %c0_i32, %arg0 : i32, i32, i32
  }
  func.func @transform_1(%arg0: i32, %arg1: i32, %arg2: memref<1xi32, #tpu.memory_space<smem>>) -> (i32, i32) {
    %c0_i32 = arith.constant 0 : i32
    return %arg1, %arg0 : i32, i32
  }
  func.func @transform_2(%arg0: i32, %arg1: i32, %arg2: memref<1xi32, #tpu.memory_space<smem>>) -> (i32, i32) {
    %c0_i32 = arith.constant 0 : i32
    %c0_i32_0 = arith.constant 0 : i32
    %c0_i32_1 = arith.constant 0 : i32
    return %c0_i32, %c0_i32_0 : i32, i32
  }
  func.func @transform_3(%arg0: i32, %arg1: i32, %arg2: memref<1xi32, #tpu.memory_space<smem>>) -> (i32, i32) {
    %c0_i32 = arith.constant 0 : i32
    %c0_i32_0 = arith.constant 0 : i32
    return %c0_i32, %arg0 : i32, i32
  }
}

</mosaic_0001>

<bundles_post_ra>
// kernel: tpu_custom_call.1
= control target key start
LH: loop header
LB: loop body
LE: loop exit
PB: predicated region body
PF: predicated region fallthrough
CT: control target
= control target key end

     0   :  { %10 = vsyncpa [#allocation6], 0  ;;  %s730_s0 = inlined_call_operand.<no memory space> [shape: s32[1], index: 0, kind: input, shape index: {}]   ;;  %s731_s1 = inlined_call_operand.hbm [shape: f32[8,8,128], index: 1, kind: input, shape index: {}]   ;;  %s732_s2 = inlined_call_operand.hbm [shape: f32[8,128], index: 2, kind: input, shape index: {}]   ;;  %s733_s3 = inlined_call_operand.hbm [shape: f32[8,8], index: 3, kind: input, shape index: {}]   ;;  %s734_s4 = inlined_call_operand.hbm [shape: f32[1,128], index: 4, kind: output, shape index: {}]  }
   0x1   :  { %11 = vsyncpa [#allocation9], 0  ;;  %s31_s17 = sshll.u32 %s732_s2, 4  ;;  %s32_s17 = int_to_ptr.hbm [resolvable:$true] %s31_s17 }
   0x2   :  { %12 = vsyncpa [#allocation7], 0  ;;  %s633_s18 = smov [#allocation8]   ;;  %s17_s22 = sshll.u32 %s731_s1, 4  ;;  %s18_s22 = int_to_ptr.hbm [resolvable:$true] %s17_s22 }
   0x3   :  { %s33_s19 = sshll.u32 %s633_s18, 4  ;;  %s634_s23 = smov [#allocation5]   ;;  %s34_s19 = int_to_ptr.vmem [resolvable:$true] %s33_s19 }
   0x4   :  { %36 = dma.hbm_to_vmem [thread:$0]  %s32_s17, 128, %s34_s19, [#allocation9]  }
   0x5   :  { %s19_s24 = sshll.u32 %s634_s23, 4  ;;  %s635_s25 = smov 128   ;;  %s20_s24 = int_to_ptr.vmem [resolvable:$true] %s19_s24 }
   0x6   :  { %s636_s26 = smov 8   ;;  %s42_s2 = sshll.u32 %s733_s3, 4  ;;  %s43_s2 = int_to_ptr.hbm [resolvable:$true] %s42_s2 }
   0x7   :  { %25 = dma.hbm_to_vmem [thread:$0]  %s18_s22, 1024, %s20_s24, [#allocation6], %s635_s25, %s635_s25, %s636_s26  }
   0x8   :  { %s637_s29 = smov [#allocation10]  }
   0x9   :  { %s44_s30 = sshll.u32 %s637_s29, 4  ;;  %s45_s30 = int_to_ptr.vmem [resolvable:$true] %s44_s30 }
   0xa   :  { %47 = dma.hbm_to_vmem [thread:$0]  %s43_s2, 128, %s45_s30, [#allocation9]  }
   0xb   :  { %627 = dma.done.wait [#allocation6], 1024  }
   0xc   :  { %628 = vsyncadd [#allocation6], 4294966272 }
   0xd   :  { %629 = dma.done.wait [#allocation9], 256  }
   0xe   :  { %630 = vsyncadd [#allocation9], 4294967040  ;;  %v65_v0 = vlaneseq  ;;  %v638_v2 = vmov -10000.0   ;;  %v678_v4 = vld [vmem:[#allocation10] sm:$0xff]  ;;  %p475_p0 = scmp.le.s32.totalorder %s730_s0, 0 }
  0x10   :  { %v675_v1 = vshrl.u32 %v65_v0, 7  ;;  %75 = sbr.rel (%p475_p0) target bundleno = 1447 (0x5a7), region = 33 }
  0x12   :  { %vm67_vm0 = vcmp.eq.s32.totalorder %v675_v1, 1 }
  0x13   :  { %v68_v3 = vsel %vm67_vm0, 0.0, %v638_v2 }
  0x14   :  { %69 = vst [vmem:[#allocation2] sm:$0xff] %v68_v3 }
  0x15   :  { %vm76_vm1 = vcmask 64512   ;;  %v119_v16 = vld [vmem:[#allocation5] sm:$0xff]  ;;  %v639_v25 = vmov 0   ;;  %v162_v36 = vld [vmem:[#allocation5 + $0x8] sm:$0xff]  ;;  %v203_v54 = vld [vmem:[#allocation5 + $0x10] sm:$0xff] }
  0x16   :  { %v77_v5 = vsel %vm76_vm1, %v678_v4, -inf  ;;  %v84_v23 = vld [vmem:[#allocation8] sm:$0xff] }
  0x17   :  { %78 = vmax.xlane.f32.xlu0 %v77_v5  ;;  %vm125_vm2 = vcmp.gt.f32.partialorder %v84_v23, 0.5 }
  0x18   :  { %v694_v26 = vsel %vm125_vm2, 1, %v639_v25 }
  0x19   :  { %v127_v27 = vperm.slane %v694_v26, 0  ;;  %v168_v45 = vperm.slane %v694_v26, 1  ;;  %v209_v63 = vperm.slane %v694_v26, 2 }
  0x1b   :  { %v83_v6 = vld [vmem:[#allocation2] sm:$0xff]  ;;  %vm128_vm3 = vcmp.eq.s32.totalorder %v127_v27, 1  ;;  %vm169_vm4 = vcmp.eq.s32.totalorder %v168_v45, 1  ;;  %vm210_vm5 = vcmp.eq.s32.totalorder %v209_v63, 1 }
  0x1c   :  { %v85_v7 = vrot.slane %v83_v6, 4 }
  0x1e   :  { %v86_v8 = vmax.f32 %v83_v6, %v85_v7 }
  0x20   :  { %v87_v9 = vrot.slane %v86_v8, 2 }
  0x22   :  { %v88_v10 = vmax.f32 %v86_v8, %v87_v9 }
  0x24   :  { %v89_v11 = vrot.slane %v88_v10, 1 }
  0x26   :  { %v90_v12 = vmax.f32 %v88_v10, %v89_v11  ;;  %v244_v10 = vld [vmem:[#allocation5 + $0x18] sm:$0xff] }
  0x28   :  { %v91_v13 = vsub.f32 %v83_v6, %v90_v12 }
  0x2a   :  { %v92_v14 = vmul.f32 1.442695, %v91_v13 }
  0x2c   :  { %492 = vpow2.f32 %v92_v14 }
  0x32   :  { %v493_v15 = vpop.eup %492 }
  0x33   :  { %112 = vmatpush.msra.mxu0 %v493_v15 }
  0x8a   :  { %v685_v17 = vpop.xlane.xlu0 %78 }
  0x8b   :  { %v80_v18 = vsub.f32 %v678_v4, %v685_v17  ;;  %v120_v19 = vadd.f32 %v119_v16, %v685_v17  ;;  %v163_v39 = vadd.f32 %v162_v36, %v685_v17  ;;  %v204_v57 = vadd.f32 %v203_v54, %v685_v17 }
  0x8c   :  { %v245_v13 = vadd.f32 %v244_v10, %v685_v17 }
  0x8d   :  { %v81_v20 = vmul.f32 1.442695, %v80_v18  ;;  %v121_v21 = vadd.f32 %v120_v19, %v90_v12 }
  0x8f   :  { %494 = vpow2.f32 %v81_v20  ;;  %v250_v20 = vperm.slane %v694_v26, 3 }
  0x91   :  { %vm251_vm6 = vcmp.eq.s32.totalorder %v250_v20, 1 }
  0x95   :  { %v690_v22 = vpop.eup %494 }
  0x96   :  { %476 = vmatmul.msk.f32.vlgmr.msra.gmra.mxu0 %vm76_vm1, %v690_v22 }
 0x113   :  { %v114_v24 = vpop.f32.mrf.mxu0 }
 0x114   :  { %496 = vlog2.f32 %v114_v24 }
 0x11a   :  { %v497_v28 = vpop.eup %496 }
 0x11b   :  { %v123_v29 = vmul.f32 0.6931472, %v497_v28 }
 0x11d   :  { %v124_v30 = vadd.f32 %v123_v29, %v121_v21 }
 0x11f   :  { %v129_v31 = vsel %vm128_vm3, %v124_v30, %v83_v6 }
 0x120   :  { %v130_v32 = vrot.slane %v129_v31, 4 }
 0x122   :  { %v131_v33 = vmax.f32 %v129_v31, %v130_v32 }
 0x124   :  { %v132_v34 = vrot.slane %v131_v33, 2 }
 0x126   :  { %v133_v35 = vmax.f32 %v131_v33, %v132_v34 }
 0x128   :  { %v134_v37 = vrot.slane %v133_v35, 1 }
 0x12a   :  { %v135_v38 = vmax.f32 %v133_v35, %v134_v37 }
 0x12c   :  { %v136_v40 = vsub.f32 %v129_v31, %v135_v38  ;;  %v164_v41 = vadd.f32 %v163_v39, %v135_v38 }
 0x12e   :  { %v137_v42 = vmul.f32 1.442695, %v136_v40  ;;  %v291_v40 = vperm.slane %v694_v26, 4 }
 0x130   :  { %498 = vpow2.f32 %v137_v42  ;;  %vm292_vm7 = vcmp.eq.s32.totalorder %v291_v40, 1 }
 0x136   :  { %v499_v43 = vpop.eup %498 }
 0x137   :  { %154 = vmatpush.msra.mxu1 %v499_v43 }
 0x138   :  { %477 = vmatmul.msk.f32.vlgmr.msra.gmra.mxu1 %vm76_vm1, %v690_v22 }
 0x1b5   :  { %v156_v44 = vpop.f32.mrf.mxu1 }
 0x1b6   :  { %500 = vlog2.f32 %v156_v44 }
 0x1bc   :  { %v501_v46 = vpop.eup %500 }
 0x1bd   :  { %v166_v47 = vmul.f32 0.6931472, %v501_v46 }
 0x1bf   :  { %v167_v48 = vadd.f32 %v166_v47, %v164_v41 }
 0x1c1   :  { %v170_v49 = vsel %vm169_vm4, %v167_v48, %v129_v31  ;;  %v285_v31 = vld [vmem:[#allocation5 + $0x20] sm:$0xff] }
 0x1c2   :  { %v171_v50 = vrot.slane %v170_v49, 4  ;;  %v286_v34 = vadd.f32 %v285_v31, %v685_v17 }
 0x1c4   :  { %v172_v51 = vmax.f32 %v170_v49, %v171_v50 }
 0x1c6   :  { %v173_v52 = vrot.slane %v172_v51, 2 }
 0x1c8   :  { %v174_v53 = vmax.f32 %v172_v51, %v173_v52 }
 0x1ca   :  { %v175_v55 = vrot.slane %v174_v53, 1 }
 0x1cc   :  { %v176_v56 = vmax.f32 %v174_v53, %v175_v55 }
 0x1ce   :  { %v177_v58 = vsub.f32 %v170_v49, %v176_v56  ;;  %v205_v59 = vadd.f32 %v204_v57, %v176_v56 }
 0x1d0   :  { %v178_v60 = vmul.f32 1.442695, %v177_v58  ;;  %v332_v58 = vperm.slane %v694_v26, 5 }
 0x1d2   :  { %502 = vpow2.f32 %v178_v60  ;;  %vm333_vm8 = vcmp.eq.s32.totalorder %v332_v58, 1 }
 0x1d8   :  { %v503_v61 = vpop.eup %502 }
 0x1d9   :  { %195 = vmatpush.msra.mxu2 %v503_v61 }
 0x1da   :  { %478 = vmatmul.msk.f32.vlgmr.msra.gmra.mxu2 %vm76_vm1, %v690_v22 }
 0x25d   :  { %v197_v62 = vpop.f32.mrf.mxu2 }
 0x25e   :  { %504 = vlog2.f32 %v197_v62 }
 0x264   :  { %v505_v0 = vpop.eup %504 }
 0x265   :  { %v207_v2 = vmul.f32 0.6931472, %v505_v0 }
 0x267   :  { %v208_v3 = vadd.f32 %v207_v2, %v205_v59 }
 0x269   :  { %v211_v5 = vsel %vm210_vm5, %v208_v3, %v170_v49  ;;  %v326_v49 = vld [vmem:[#allocation5 + $0x28] sm:$0xff] }
 0x26a   :  { %v212_v6 = vrot.slane %v211_v5, 4  ;;  %v327_v52 = vadd.f32 %v326_v49, %v685_v17 }
 0x26c   :  { %v213_v7 = vmax.f32 %v211_v5, %v212_v6 }
 0x26e   :  { %v214_v8 = vrot.slane %v213_v7, 2 }
 0x270   :  { %v215_v9 = vmax.f32 %v213_v7, %v214_v8 }
 0x272   :  { %v216_v11 = vrot.slane %v215_v9, 1 }
 0x274   :  { %v217_v12 = vmax.f32 %v215_v9, %v216_v11 }
 0x276   :  { %v218_v14 = vsub.f32 %v211_v5, %v217_v12  ;;  %v246_v15 = vadd.f32 %v245_v13, %v217_v12 }
 0x278   :  { %v219_v16 = vmul.f32 1.442695, %v218_v14  ;;  %v373_v14 = vperm.slane %v694_v26, 6 }
 0x27a   :  { %506 = vpow2.f32 %v219_v16  ;;  %vm374_vm9 = vcmp.eq.s32.totalorder %v373_v14, 1 }
 0x280   :  { %v507_v18 = vpop.eup %506 }
 0x281   :  { %236 = vmatpush.msra.mxu3 %v507_v18 }
 0x282   :  { %479 = vmatmul.msk.f32.vlgmr.msra.gmra.mxu3 %vm76_vm1, %v690_v22 }
 0x305   :  { %v238_v19 = vpop.f32.mrf.mxu3 }
 0x306   :  { %508 = vlog2.f32 %v238_v19 }
 0x30c   :  { %v509_v21 = vpop.eup %508 }
 0x30d   :  { %v248_v23 = vmul.f32 0.6931472, %v509_v21 }
 0x30f   :  { %v249_v24 = vadd.f32 %v248_v23, %v246_v15 }
 0x311   :  { %v252_v25 = vsel %vm251_vm6, %v249_v24, %v211_v5  ;;  %v367_v5 = vld [vmem:[#allocation5 + $0x30] sm:$0xff] }
 0x312   :  { %v253_v27 = vrot.slane %v252_v25, 4  ;;  %v368_v8 = vadd.f32 %v367_v5, %v685_v17 }
 0x314   :  { %v254_v28 = vmax.f32 %v252_v25, %v253_v27 }
 0x316   :  { %v255_v29 = vrot.slane %v254_v28, 2 }
 0x318   :  { %v256_v30 = vmax.f32 %v254_v28, %v255_v29 }
 0x31a   :  { %v257_v32 = vrot.slane %v256_v30, 1 }
 0x31c   :  { %v258_v33 = vmax.f32 %v256_v30, %v257_v32 }
 0x31e   :  { %v259_v35 = vsub.f32 %v252_v25, %v258_v33  ;;  %v287_v36 = vadd.f32 %v286_v34, %v258_v33 }
 0x320   :  { %v260_v37 = vmul.f32 1.442695, %v259_v35  ;;  %v414_v35 = vperm.slane %v694_v26, 7 }
 0x322   :  { %510 = vpow2.f32 %v260_v37  ;;  %vm415_vm10 = vcmp.eq.s32.totalorder %v414_v35, 1 }
 0x328   :  { %v511_v38 = vpop.eup %510 }
 0x329   :  { %277 = vmatpush.msrb.mxu0 %v511_v38 }
 0x32a   :  { %480 = vmatmul.msk.f32.vlgmr.msrb.gmra.mxu0 %vm76_vm1, %v690_v22 }
 0x3a7   :  { %v279_v39 = vpop.f32.mrf.mxu0 }
 0x3a8   :  { %512 = vlog2.f32 %v279_v39 }
 0x3ae   :  { %v513_v41 = vpop.eup %512 }
 0x3af   :  { %v289_v42 = vmul.f32 0.6931472, %v513_v41 }
 0x3b1   :  { %v290_v43 = vadd.f32 %v289_v42, %v287_v36 }
 0x3b3   :  { %v293_v44 = vsel %vm292_vm7, %v290_v43, %v252_v25  ;;  %v408_v25 = vld [vmem:[#allocation5 + $0x38] sm:$0xff] }
 0x3b4   :  { %v294_v45 = vrot.slane %v293_v44, 4  ;;  %v409_v29 = vadd.f32 %v408_v25, %v685_v17 }
 0x3b6   :  { %v295_v46 = vmax.f32 %v293_v44, %v294_v45 }
 0x3b8   :  { %v296_v47 = vrot.slane %v295_v46, 2 }
 0x3ba   :  { %v297_v48 = vmax.f32 %v295_v46, %v296_v47 }
 0x3bc   :  { %v298_v50 = vrot.slane %v297_v48, 1 }
 0x3be   :  { %v299_v51 = vmax.f32 %v297_v48, %v298_v50 }
 0x3c0   :  { %v300_v53 = vsub.f32 %v293_v44, %v299_v51  ;;  %v328_v54 = vadd.f32 %v327_v52, %v299_v51 }
 0x3c2   :  { %v301_v55 = vmul.f32 1.442695, %v300_v53 }
 0x3c4   :  { %514 = vpow2.f32 %v301_v55 }
 0x3ca   :  { %v515_v56 = vpop.eup %514 }
 0x3cb   :  { %318 = vmatpush.msrb.mxu1 %v515_v56 }
 0x3cc   :  { %481 = vmatmul.msk.f32.vlgmr.msrb.gmra.mxu1 %vm76_vm1, %v690_v22 }
 0x449   :  { %v320_v57 = vpop.f32.mrf.mxu1 }
 0x44a   :  { %516 = vlog2.f32 %v320_v57 }
 0x450   :  { %v517_v59 = vpop.eup %516 }
 0x451   :  { %v330_v60 = vmul.f32 0.6931472, %v517_v59 }
 0x453   :  { %v331_v61 = vadd.f32 %v330_v60, %v328_v54 }
 0x455   :  { %v334_v62 = vsel %vm333_vm8, %v331_v61, %v293_v44 }
 0x456   :  { %v335_v63 = vrot.slane %v334_v62, 4 }
 0x458   :  { %v336_v0 = vmax.f32 %v334_v62, %v335_v63 }
 0x45a   :  { %v337_v2 = vrot.slane %v336_v0, 2 }
 0x45c   :  { %v338_v3 = vmax.f32 %v336_v0, %v337_v2 }
 0x45e   :  { %v339_v6 = vrot.slane %v338_v3, 1 }
 0x460   :  { %v340_v7 = vmax.f32 %v338_v3, %v339_v6 }
 0x462   :  { %v341_v9 = vsub.f32 %v334_v62, %v340_v7  ;;  %v369_v10 = vadd.f32 %v368_v8, %v340_v7 }
 0x464   :  { %v342_v11 = vmul.f32 1.442695, %v341_v9 }
 0x466   :  { %518 = vpow2.f32 %v342_v11 }
 0x46c   :  { %v519_v12 = vpop.eup %518 }
 0x46d   :  { %359 = vmatpush.msrb.mxu2 %v519_v12 }
 0x46e   :  { %482 = vmatmul.msk.f32.vlgmr.msrb.gmra.mxu2 %vm76_vm1, %v690_v22 }
 0x4f1   :  { %v361_v13 = vpop.f32.mrf.mxu2 }
 0x4f2   :  { %520 = vlog2.f32 %v361_v13 }
 0x4f8   :  { %v521_v15 = vpop.eup %520 }
 0x4f9   :  { %v371_v16 = vmul.f32 0.6931472, %v521_v15 }
 0x4fb   :  { %v372_v18 = vadd.f32 %v371_v16, %v369_v10 }
 0x4fd   :  { %v375_v19 = vsel %vm374_vm9, %v372_v18, %v334_v62 }
 0x4fe   :  { %v376_v20 = vrot.slane %v375_v19, 4 }
 0x500   :  { %v377_v21 = vmax.f32 %v375_v19, %v376_v20 }
 0x502   :  { %v378_v23 = vrot.slane %v377_v21, 2 }
 0x504   :  { %v379_v24 = vmax.f32 %v377_v21, %v378_v23 }
 0x506   :  { %v380_v27 = vrot.slane %v379_v24, 1 }
 0x508   :  { %v381_v28 = vmax.f32 %v379_v24, %v380_v27 }
 0x50a   :  { %v382_v30 = vsub.f32 %v375_v19, %v381_v28  ;;  %v410_v31 = vadd.f32 %v409_v29, %v381_v28 }
 0x50c   :  { %v383_v32 = vmul.f32 1.442695, %v382_v30 }
 0x50e   :  { %522 = vpow2.f32 %v383_v32 }
 0x514   :  { %v523_v33 = vpop.eup %522 }
 0x515   :  { %400 = vmatpush.msrb.mxu3 %v523_v33 }
 0x516   :  { %483 = vmatmul.msk.f32.vlgmr.msrb.gmra.mxu3 %vm76_vm1, %v690_v22 }
 0x599   :  { %v402_v34 = vpop.f32.mrf.mxu3 }
 0x59a   :  { %524 = vlog2.f32 %v402_v34 }
 0x5a0   :  { %v525_v36 = vpop.eup %524 }
 0x5a1   :  { %v412_v37 = vmul.f32 0.6931472, %v525_v36 }
 0x5a3   :  { %v413_v38 = vadd.f32 %v412_v37, %v410_v31 }
 0x5a5   :  { %v416_v39 = vsel %vm415_vm10, %v413_v38, %v375_v19 }
 0x5a6   :  { %417 = vst [vmem:[#allocation2] sm:$0xff] %v416_v39 }
 0x5a7 PF:  { %526 = vset.pattern.permute.xlu0 %v675_v1  ;;  %v422_v17 = vperm.slane %v678_v4, 2  ;;  %s640_s0 = smov [#allocation11]   ;;  %s456_s8 = sshll.u32 %s734_s4, 4  ;;  %s457_s8 = int_to_ptr.hbm [resolvable:$true] %s456_s8 }
 0x5a8   :  { %s454_s5 = sshll.u32 %s640_s0, 4  ;;  %s455_s5 = int_to_ptr.vmem [resolvable:$true] %s454_s5 }
 0x5ad   :  { %v421_v40 = vld [vmem:[#allocation2] sm:$0xff] }
 0x5af   :  { %427 = vperm.xlu0 %526, %v422_v17  }
 0x621   :  { %v428_v41 = vpop.permute.xlu0 %427 }
 0x622   :  { %v429_v42 = vadd.f32 %v428_v41, %v421_v40 }
 0x624   :  { %v430_v22 = vrot.slane %v429_v42, 4 }
 0x626   :  { %v431_v43 = vmax.f32 %v429_v42, %v430_v22 }
 0x628   :  { %v432_v44 = vrot.slane %v431_v43, 2 }
 0x62a   :  { %v433_v45 = vmax.f32 %v431_v43, %v432_v44 }
 0x62c   :  { %v434_v26 = vrot.slane %v433_v45, 1 }
 0x62e   :  { %v435_v46 = vmax.f32 %v433_v45, %v434_v26 }
 0x630   :  { %v436_v47 = vsub.f32 %v429_v42, %v435_v46 }
 0x632   :  { %v437_v48 = vmul.f32 1.442695, %v436_v47 }
 0x634   :  { %527 = vpow2.f32 %v437_v48 }
 0x63a   :  { %v528_v49 = vpop.eup %527 }
 0x63b   :  { %v439_v50 = vrot.slane %v528_v49, 4 }
 0x63d   :  { %v440_v51 = vadd.f32 %v528_v49, %v439_v50 }
 0x63f   :  { %v441_v52 = vrot.slane %v440_v51, 2 }
 0x641   :  { %v442_v1 = vadd.f32 %v441_v52, %v440_v51 }
 0x643   :  { %v443_v53 = vrot.slane %v442_v1, 1 }
 0x645   :  { %v444_v4 = vadd.f32 %v443_v53, %v442_v1 }
 0x647   :  { %529 = vlog2.f32 %v444_v4 }
 0x64d   :  { %v530_v54 = vpop.eup %529 }
 0x64e   :  { %v446_v55 = vmul.f32 0.6931472, %v530_v54 }
 0x650   :  { %v447_v56 = vadd.f32 %v446_v55, %v435_v46 }
 0x652   :  { %448 = vst [vmem:[#allocation11] sm:$0x1] %v447_v56 }
 0x653   :  { %459 = dma.vmem_to_hbm [thread:$0]  %s455_s5, 16, %s457_s8, [#allocation7]  }
 0x654   :  { %631 = dma.done.wait [#allocation7], 16  }
 0x655   :  { %632 = vsyncadd [#allocation7], 4294967280 }
 0x656   :  { %464 = vsyncpa [#allocation6], 1 }
 0x657   :  { %465 = vsyncpa [#allocation9], 1 }
 0x658   :  { %466 = vsyncpa [#allocation7], 1 }

</bundles_post_ra>
